<compile_context>
chip_gen: v7x
topology: tpu7x:2x2x1
jax: 0.10.0
libtpu: 0.0.40
codegen_flags: <defaults>
</compile_context>

<pallas_src>
import functools
import math

import jax
import jax.numpy as jnp
from jax.experimental import pallas as pl
from jax.experimental.pallas import tpu as pltpu

BF16 = jnp.bfloat16
_VMEM_LIMIT = 32 * 1024 * 1024  # >= v6e/v7x scoped default; 2x the v5e default.


# ----------------------------------------------------------------------------
# Helpers
# ----------------------------------------------------------------------------

def _pick(dim, pref, align):
    """Largest tile <= pref that divides `dim` and is `align`-aligned, else the full dim."""
    if dim <= pref:
        return dim
    t = (pref // align) * align
    while t >= align:
        if dim % t == 0:
            return t
        t -= align
    return dim


def _cparams(dim_sem):
    return pltpu.CompilerParams(dimension_semantics=dim_sem,
                                vmem_limit_bytes=_VMEM_LIMIT)


# ----------------------------------------------------------------------------
# Tiled matmul + bias:  o = x @ w + b       (bf16 operands, f32 accumulate)
# ----------------------------------------------------------------------------

def _matmul_bias_kernel(x_ref, w_ref, b_ref, o_ref, acc_ref):
    k = pl.program_id(2)

    @pl.when(k == 0)
    def _():
        acc_ref[...] = jnp.zeros_like(acc_ref)

    acc_ref[...] += jnp.dot(x_ref[...], w_ref[...],
                            preferred_element_type=jnp.float32)

    @pl.when(k == pl.num_programs(2) - 1)
    def _():
        o_ref[...] = (acc_ref[...] + b_ref[...]).astype(o_ref.dtype)


def matmul_bias(x2d, w, b, *, out_dtype=BF16, tm=256, tn=512, tk=512):
    M, K = x2d.shape
    _, N = w.shape
    tm = _pick(M, tm, 8)
    tn = _pick(N, tn, 128)
    tk = _pick(K, tk, 128)
    grid = (M // tm, N // tn, K // tk)
    bi = x2d.dtype.itemsize
    return pl.pallas_call(
        _matmul_bias_kernel,
        out_shape=jax.ShapeDtypeStruct((M, N), out_dtype),
        grid_spec=pltpu.PrefetchScalarGridSpec(
            num_scalar_prefetch=0,
            grid=grid,
            in_specs=[
                pl.BlockSpec((tm, tk), lambda i, j, k: (i, k)),
                pl.BlockSpec((tk, tn), lambda i, j, k: (k, j)),
                pl.BlockSpec((1, tn), lambda i, j, k: (0, j)),
            ],
            out_specs=pl.BlockSpec((tm, tn), lambda i, j, k: (i, j)),
            scratch_shapes=[pltpu.VMEM((tm, tn), jnp.float32)],
        ),
        compiler_params=_cparams(("parallel", "parallel", "arbitrary")),
        cost_estimate=pl.CostEstimate(
            flops=2 * M * N * K, transcendentals=0,
            bytes_accessed=bi * (M * K + K * N) + 4 * N + 2 * M * N),
    )(x2d, w, b)


# ----------------------------------------------------------------------------
# Fused: o = LayerNorm(residual + (x @ w + b)) * gamma + beta    (MHA out-proj)
# ----------------------------------------------------------------------------

def _proj_res_ln_kernel(x_ref, w_ref, b_ref, r_ref, g_ref, be_ref, o_ref, acc_ref):
    k = pl.program_id(1)

    @pl.when(k == 0)
    def _():
        acc_ref[...] = jnp.zeros_like(acc_ref)

    acc_ref[...] += jnp.dot(x_ref[...], w_ref[...],
                            preferred_element_type=jnp.float32)

    @pl.when(k == pl.num_programs(1) - 1)
    def _():
        y = acc_ref[...] + b_ref[...] + r_ref[...].astype(jnp.float32)
        mu = jnp.mean(y, axis=-1, keepdims=True)
        var = jnp.mean(jnp.square(y - mu), axis=-1, keepdims=True)
        o_ref[...] = ((y - mu) * jax.lax.rsqrt(var + 1e-5) * g_ref[...]
                      + be_ref[...]).astype(o_ref.dtype)


def proj_res_ln(x2d, w, b, res2d, gamma, beta, *, tm=256, tk=512):
    M, K = x2d.shape
    D = w.shape[1]
    tm = _pick(M, tm, 8)
    tk = _pick(K, tk, 128)
    g = gamma.reshape(1, D)
    be = beta.reshape(1, D)
    grid = (M // tm, K // tk)
    return pl.pallas_call(
        _proj_res_ln_kernel,
        out_shape=jax.ShapeDtypeStruct((M, D), BF16),
        grid_spec=pltpu.PrefetchScalarGridSpec(
            num_scalar_prefetch=0,
            grid=grid,
            in_specs=[
                pl.BlockSpec((tm, tk), lambda i, k: (i, k)),
                pl.BlockSpec((tk, D), lambda i, k: (k, 0)),
                pl.BlockSpec((1, D), lambda i, k: (0, 0)),
                pl.BlockSpec((tm, D), lambda i, k: (i, 0)),
                pl.BlockSpec((1, D), lambda i, k: (0, 0)),
                pl.BlockSpec((1, D), lambda i, k: (0, 0)),
            ],
            out_specs=pl.BlockSpec((tm, D), lambda i, k: (i, 0)),
            scratch_shapes=[pltpu.VMEM((tm, D), jnp.float32)],
        ),
        compiler_params=_cparams(("parallel", "arbitrary")),
        cost_estimate=pl.CostEstimate(
            flops=2 * M * K * D, transcendentals=0,
            bytes_accessed=2 * (M * K + K * D + 2 * M * D)),
    )(x2d, w, b, res2d, g, be)


# ----------------------------------------------------------------------------
# Fused FFN + residual + LN:
#   o = LayerNorm(x + (relu(x @ w1 + b1) @ w2 + b2)) * gamma + beta
# ----------------------------------------------------------------------------

def _ffn_res_ln_kernel(x_ref, w1_ref, b1_ref, w2_ref, b2_ref, g_ref, be_ref,
                       o_ref, acc_ref):
    f = pl.program_id(1)

    @pl.when(f == 0)
    def _():
        acc_ref[...] = jnp.zeros_like(acc_ref)

    h = jnp.dot(x_ref[...], w1_ref[...],
                preferred_element_type=jnp.float32) + b1_ref[...]
    h = jnp.maximum(h, 0.0)  # ReLU; dropout is identity at inference
    acc_ref[...] += jnp.dot(h.astype(BF16), w2_ref[...],
                            preferred_element_type=jnp.float32)

    @pl.when(f == pl.num_programs(1) - 1)
    def _():
        y = acc_ref[...] + b2_ref[...] + x_ref[...].astype(jnp.float32)
        mu = jnp.mean(y, axis=-1, keepdims=True)
        var = jnp.mean(jnp.square(y - mu), axis=-1, keepdims=True)
        o_ref[...] = ((y - mu) * jax.lax.rsqrt(var + 1e-5) * g_ref[...]
                      + be_ref[...]).astype(o_ref.dtype)


def ffn_res_ln(x2d, w1, b1, w2, b2, gamma, beta, *, tm=256, tf=512):
    M, D = x2d.shape
    Dff = w1.shape[1]
    tm = _pick(M, tm, 8)
    tf = _pick(Dff, tf, 128)
    g = gamma.reshape(1, D)
    be = beta.reshape(1, D)
    grid = (M // tm, Dff // tf)
    return pl.pallas_call(
        _ffn_res_ln_kernel,
        out_shape=jax.ShapeDtypeStruct((M, D), BF16),
        grid_spec=pltpu.PrefetchScalarGridSpec(
            num_scalar_prefetch=0,
            grid=grid,
            in_specs=[
                pl.BlockSpec((tm, D), lambda i, f: (i, 0)),
                pl.BlockSpec((D, tf), lambda i, f: (0, f)),
                pl.BlockSpec((1, tf), lambda i, f: (0, f)),
                pl.BlockSpec((tf, D), lambda i, f: (f, 0)),
                pl.BlockSpec((1, D), lambda i, f: (0, 0)),
                pl.BlockSpec((1, D), lambda i, f: (0, 0)),
                pl.BlockSpec((1, D), lambda i, f: (0, 0)),
            ],
            out_specs=pl.BlockSpec((tm, D), lambda i, f: (i, 0)),
            scratch_shapes=[pltpu.VMEM((tm, D), jnp.float32)],
        ),
        compiler_params=_cparams(("parallel", "arbitrary")),
        cost_estimate=pl.CostEstimate(
            flops=4 * M * D * Dff, transcendentals=0,
            bytes_accessed=2 * (2 * M * D + 2 * D * Dff + M * D)),
    )(x2d, w1, b1, w2, b2, g, be)


# ----------------------------------------------------------------------------
# Attention: grid over (batch, q-tile); heads handled in-kernel.
# q/k/v column blocks are selected directly from the fused projection outputs
# via the BlockSpec index maps (no XLA column slices / HBM round trips).
# ----------------------------------------------------------------------------

def _attn_math(q_ref, k_ref, v_ref, m_ref, n_heads, inv_scale):
    _, Sq, D = q_ref.shape
    Sk = k_ref.shape[1]
    dh = D // n_heads
    # Fold 1/scale into the (small) q tile; head split/relayout done in f32,
    # then cast to bf16 so the MXU sees bf16 operands.
    qf = q_ref[0].astype(jnp.float32) * inv_scale
    q = qf.reshape(Sq, n_heads, dh).transpose(1, 0, 2).astype(BF16)            # (H,Sq,dh)
    k = k_ref[0].astype(jnp.float32).reshape(Sk, n_heads, dh).transpose(1, 0, 2).astype(BF16)
    v = v_ref[0].astype(jnp.float32).reshape(Sk, n_heads, dh).transpose(1, 0, 2).astype(BF16)
    s = jnp.einsum("hqd,hkd->hqk", q, k, preferred_element_type=jnp.float32)   # f32 scores
    s = jnp.where(m_ref[0] != 0, -1e10, s)              # mask != 0 => masked
    s = s - jnp.max(s, axis=-1, keepdims=True)
    p = jnp.exp(s)                                      # unnormalized probs (f32)
    denom = jnp.sum(p, axis=-1, keepdims=True)
    o = jnp.einsum("hqk,hkd->hqd", p.astype(BF16), v,
                   preferred_element_type=jnp.float32)
    # Normalize after PV: (Sq, D) elements instead of (Sq, Sk); approx -> EUP.
    o = o * pl.reciprocal(denom, approx=True)
    ctx = o.transpose(1, 0, 2).reshape(Sq, D)
    return ctx, p, denom


def _attn_kernel(q_ref, k_ref, v_ref, m_ref, o_ref, *, n_heads, inv_scale):
    ctx, _, _ = _attn_math(q_ref, k_ref, v_ref, m_ref, n_heads, inv_scale)
    o_ref[0] = ctx.astype(o_ref.dtype)


def _attn_kernel_save(q_ref, k_ref, v_ref, m_ref, o_ref, w_ref, *, n_heads, inv_scale):
    ctx, p, denom = _attn_math(q_ref, k_ref, v_ref, m_ref, n_heads, inv_scale)
    o_ref[0] = ctx.astype(o_ref.dtype)
    w_ref[0] = (p * pl.reciprocal(denom, approx=False)).astype(w_ref.dtype)


def attention(q_src, kv_src, mask_i8, n_heads, scale, *, d_model,
              q_col, k_col, v_col, save_weights=False, tq_pref=128):
    """q_src: (B, Sq, nq*D); kv_src: (B, Sk, nkv*D); columns selected by block index."""
    B, Sq, _ = q_src.shape
    Sk = kv_src.shape[1]
    H = n_heads
    D = d_model
    tq = _pick(Sq, tq_pref, 32)
    grid = (B, Sq // tq)
    inv_scale = 1.0 / scale
    in_specs = [
        pl.BlockSpec((1, tq, D), lambda b, qi: (b, qi, q_col)),
        pl.BlockSpec((1, Sk, D), lambda b, qi: (b, 0, k_col)),
        pl.BlockSpec((1, Sk, D), lambda b, qi: (b, 0, v_col)),
        pl.BlockSpec((1, H, tq, Sk), lambda b, qi: (b, 0, qi, 0)),
    ]
    o_spec = pl.BlockSpec((1, tq, D), lambda b, qi: (b, qi, 0))
    if save_weights:
        kern = functools.partial(_attn_kernel_save, n_heads=H, inv_scale=inv_scale)
        ctx, w = pl.pallas_call(
            kern,
            out_shape=(jax.ShapeDtypeStruct((B, Sq, D), BF16),
                       jax.ShapeDtypeStruct((B, H, Sq, Sk), jnp.float32)),
            grid=grid,
            in_specs=in_specs,
            out_specs=(o_spec,
                       pl.BlockSpec((1, H, tq, Sk), lambda b, qi: (b, 0, qi, 0))),
            compiler_params=_cparams(("parallel", "parallel")),
        )(q_src, kv_src, kv_src, mask_i8)
        return ctx, w
    kern = functools.partial(_attn_kernel, n_heads=H, inv_scale=inv_scale)
    ctx = pl.pallas_call(
        kern,
        out_shape=jax.ShapeDtypeStruct((B, Sq, D), BF16),
        grid=grid,
        in_specs=in_specs,
        out_specs=o_spec,
        compiler_params=_cparams(("parallel", "parallel")),
    )(q_src, kv_src, kv_src, mask_i8)
    return ctx, None


# ----------------------------------------------------------------------------
# Module forward (glue in plain JAX: reshapes, embedding gather)
# ----------------------------------------------------------------------------

def decoder_layer_forward(x, enc_out, dec_mask, enc_dec_mask, p, n_heads, save):
    B, S, D = x.shape
    Se = enc_out.shape[1]
    scale = math.sqrt(D / n_heads)  # matches torch.sqrt(d_model / n_heads)

    # ---- masked self-attention (fused QKV projection, bf16 output) ----
    x2d = x.reshape(B * S, D)
    qkv = matmul_bias(x2d, p["sa"]["w_qkv"], p["sa"]["b_qkv"]).reshape(B, S, 3 * D)
    ctx, a_dec = attention(qkv, qkv, dec_mask, n_heads, scale, d_model=D,
                           q_col=0, k_col=1, v_col=2, save_weights=save)
    x2d = proj_res_ln(ctx.reshape(B * S, D), p["sa"]["wo"], p["sa"]["bo"],
                      x2d, p["ln1_g"], p["ln1_b"])

    # ---- encoder-decoder attention (fused KV projection of enc_out) ----
    q = matmul_bias(x2d, p["ca"]["wq"], p["ca"]["bq"]).reshape(B, S, D)
    kv = matmul_bias(enc_out.reshape(B * Se, D), p["ca"]["w_kv"],
                     p["ca"]["b_kv"]).reshape(B, Se, 2 * D)
    ctx, a_ed = attention(q, kv, enc_dec_mask, n_heads, scale, d_model=D,
                          q_col=0, k_col=0, v_col=1, save_weights=save)
    x2d = proj_res_ln(ctx.reshape(B * S, D), p["ca"]["wo"], p["ca"]["bo"],
                      x2d, p["ln2_g"], p["ln2_b"])

    # ---- feed-forward (fused residual + LN epilogue) ----
    x2d = ffn_res_ln(x2d, p["w1"], p["b1"], p["w2"], p["b2"],
                     p["ln3_g"], p["ln3_b"])
    return x2d.reshape(B, S, D), a_dec, a_ed


def decoder_forward(params, trg, enc_out, dec_mask, enc_dec_mask, atten_map_save=False):
    B, S = trg.shape
    D = params["tok_emb"].shape[1]
    assert D % 128 == 0, "d_model must be a multiple of 128 for lane-dense head blocks"
    # Embedding gather + positional embedding stay in plain JAX; dropout = identity.
    x = (math.sqrt(D) * jnp.take(params["tok_emb"], trg, axis=0)
         + jnp.take(params["pos_emb"], jnp.arange(S), axis=0)[None, :, :]).astype(BF16)
    enc_bf = enc_out.astype(BF16)
    dec_m = (dec_mask != 0).astype(jnp.int8)        # int8 mask: 4x fewer DMA bytes
    ed_m = (enc_dec_mask != 0).astype(jnp.int8)
    atten_decs, atten_eds = [], []
    for lp in params["layers"]:
        x, a_dec, a_ed = decoder_layer_forward(
            x, enc_bf, dec_m, ed_m, lp, params["n_heads"], atten_map_save)
        if atten_map_save:
            atten_decs.append(a_dec[0])   # matches torch: only batch element 0 is saved
            atten_eds.append(a_ed[0])
    logits = matmul_bias(x.reshape(B * S, D), params["w_out"], params["b_out"],
                         out_dtype=jnp.float32).reshape(B, S, -1)
    if atten_map_save:
        return logits, jnp.stack(atten_decs), jnp.stack(atten_eds)
    empty = jnp.zeros((0,), jnp.float32)
    return logits, empty, empty


# ----------------------------------------------------------------------------
# Deterministic parameter init (synthetic; no checkpoint / tokenizer loading).
# Matmul weights are stored in bf16 (MXU operands); biases/LN/embeddings in f32.
# ----------------------------------------------------------------------------

def _dense(key, fan_in, fan_out):
    kw, kb = jax.random.split(key)
    w = (0.02 * jax.random.normal(kw, (fan_in, fan_out), jnp.float32)).astype(BF16)
    b = 0.02 * jax.random.normal(kb, (1, fan_out), jnp.float32)
    return w, b


def init_params(key, vocab_size, max_len, n_layers, d_model, d_ff, n_heads):
    keys = jax.random.split(key, 2 + n_layers)
    tok_emb = 0.02 * jax.random.normal(keys[0], (vocab_size, d_model), jnp.float32)
    pos_emb = 0.02 * jax.random.normal(keys[1], (max_len, d_model), jnp.float32)
    layers = []
    for li in range(n_layers):
        lk = jax.random.split(keys[2 + li], 10)
        wq, bq = _dense(lk[0], d_model, d_model)
        wk, bk = _dense(lk[1], d_model, d_model)
        wv, bv = _dense(lk[2], d_model, d_model)
        wo, bo = _dense(lk[3], d_model, d_model)
        cq, cbq = _dense(lk[4], d_model, d_model)
        ck, cbk = _dense(lk[5], d_model, d_model)
        cv, cbv = _dense(lk[6], d_model, d_model)
        co, cbo = _dense(lk[7], d_model, d_model)
        w1, b1 = _dense(lk[8], d_model, d_ff)
        w2, b2 = _dense(lk[9], d_ff, d_model)
        layers.append({
            "sa": {"w_qkv": jnp.concatenate([wq, wk, wv], axis=1),
                   "b_qkv": jnp.concatenate([bq, bk, bv], axis=1),
                   "wo": wo, "bo": bo},
            "ca": {"wq": cq, "bq": cbq,
                   "w_kv": jnp.concatenate([ck, cv], axis=1),
                   "b_kv": jnp.concatenate([cbk, cbv], axis=1),
                   "wo": co, "bo": cbo},
            "w1": w1, "b1": b1, "w2": w2, "b2": b2,
            "ln1_g": jnp.ones((d_model,), jnp.float32),
            "ln1_b": jnp.zeros((d_model,), jnp.float32),
            "ln2_g": jnp.ones((d_model,), jnp.float32),
            "ln2_b": jnp.zeros((d_model,), jnp.float32),
            "ln3_g": jnp.ones((d_model,), jnp.float32),
            "ln3_b": jnp.zeros((d_model,), jnp.float32),
        })
    w_out, b_out = _dense(jax.random.fold_in(key, 12345), d_model, vocab_size)
    return {"tok_emb": tok_emb, "pos_emb": pos_emb, "layers": layers,
            "w_out": w_out, "b_out": b_out, "n_heads": n_heads}


# ----------------------------------------------------------------------------
# Pure-JAX reference (mirrors the bf16 operand / f32 accumulation scheme)
# ----------------------------------------------------------------------------

def _ref_mm(x_bf, w_bf, b_f32):
    return jnp.dot(x_bf, w_bf, preferred_element_type=jnp.float32) + b_f32[0]


def _ref_ln(y, g, b):
    mu = jnp.mean(y, axis=-1, keepdims=True)
    var = jnp.mean(jnp.square(y - mu), axis=-1, keepdims=True)
    return (y - mu) * jax.lax.rsqrt(var + 1e-5) * g + b


def _ref_mha(x_q, x_kv, wq, bq, wk, bk, wv, bv, wo, bo, n_heads, mask):
    B, Sq, D = x_q.shape
    Sk = x_kv.shape[1]
    dh = D // n_heads
    inv_scale = 1.0 / math.sqrt(D / n_heads)
    q = (_ref_mm(x_q, wq, bq).astype(BF16) * inv_scale
         ).reshape(B, Sq, n_heads, dh).transpose(0, 2, 1, 3)
    k = _ref_mm(x_kv, wk, bk).astype(BF16).reshape(B, Sk, n_heads, dh).transpose(0, 2, 1, 3)
    v = _ref_mm(x_kv, wv, bv).astype(BF16).reshape(B, Sk, n_heads, dh).transpose(0, 2, 1, 3)
    s = jnp.einsum("bhqd,bhkd->bhqk", q, k, preferred_element_type=jnp.float32)
    s = jnp.where(mask != 0, -1e10, s)
    s = s - jnp.max(s, axis=-1, keepdims=True)
    p = jnp.exp(s)
    den = jnp.sum(p, axis=-1, keepdims=True)
    o = jnp.einsum("bhqk,bhkd->bhqd", p.astype(BF16), v,
                   preferred_element_type=jnp.float32) / den
    ctx = o.transpose(0, 2, 1, 3).reshape(B, Sq, D).astype(BF16)
    return _ref_mm(ctx, wo, bo), p / den


def ref_decoder(params, trg, enc_out, dec_mask, enc_dec_mask):
    D = params["tok_emb"].shape[1]
    H = params["n_heads"]
    x = (math.sqrt(D) * params["tok_emb"][trg]
         + params["pos_emb"][jnp.arange(trg.shape[1])][None]).astype(BF16)
    enc_bf = enc_out.astype(BF16)
    for p in params["layers"]:
        sa, ca = p["sa"], p["ca"]
        wq, wk, wv = sa["w_qkv"][:, :D], sa["w_qkv"][:, D:2 * D], sa["w_qkv"][:, 2 * D:]
        bq, bk, bv = sa["b_qkv"][:, :D], sa["b_qkv"][:, D:2 * D], sa["b_qkv"][:, 2 * D:]
        r, _ = _ref_mha(x, x, wq, bq, wk, bk, wv, bv, sa["wo"], sa["bo"], H, dec_mask)
        x = _ref_ln(r + x.astype(jnp.float32), p["ln1_g"], p["ln1_b"]).astype(BF16)
        wk2, wv2 = ca["w_kv"][:, :D], ca["w_kv"][:, D:]
        bk2, bv2 = ca["b_kv"][:, :D], ca["b_kv"][:, D:]
        r, _ = _ref_mha(x, enc_bf, ca["wq"], ca["bq"], wk2, bk2, wv2, bv2,
                        ca["wo"], ca["bo"], H, enc_dec_mask)
        x = _ref_ln(r + x.astype(jnp.float32), p["ln2_g"], p["ln2_b"]).astype(BF16)
        h = jnp.maximum(jnp.dot(x, p["w1"], preferred_element_type=jnp.float32)
                        + p["b1"][0], 0.0)
        r = jnp.dot(h.astype(BF16), p["w2"],
                    preferred_element_type=jnp.float32) + p["b2"][0]
        x = _ref_ln(r + x.astype(jnp.float32), p["ln3_g"], p["ln3_b"]).astype(BF16)
    return (jnp.dot(x, params["w_out"], preferred_element_type=jnp.float32)
            + params["b_out"][0])


# ----------------------------------------------------------------------------
# Demo
# ----------------------------------------------------------------------------

if __name__ == "__main__":
    B, S_dec, S_enc = 2, 16, 16
    d_model, d_ff, n_heads, n_layers = 256, 512, 4, 2
    vocab_size, max_len = 512, 64  # synthetic vocab (128-aligned) instead of MarianTokenizer

    key = jax.random.PRNGKey(0)
    k_param, k_trg, k_enc = jax.random.split(key, 3)

    params = init_params(k_param, vocab_size, max_len, n_layers, d_model, d_ff, n_heads)
    trg = jax.random.randint(k_trg, (B, S_dec), 0, vocab_size, dtype=jnp.int32)
    enc_out = jax.random.normal(k_enc, (B, S_enc, d_model), jnp.float32)

    # dec_mask: causal (mask future positions). enc_dec_mask: pad last 2
    # encoder positions of batch element 1. mask != 0 => masked.
    causal = (jnp.arange(S_dec)[:, None] < jnp.arange(S_dec)[None, :]).astype(jnp.int32)
    dec_mask = jnp.broadcast_to(causal[None, None], (B, n_heads, S_dec, S_dec))
    pad = jnp.zeros((B, S_enc), jnp.int32).at[1, -2:].set(1)
    enc_dec_mask = jnp.broadcast_to(pad[:, None, None, :], (B, n_heads, S_dec, S_enc))

    # Default path: no attention-weight writeback.
    logits, _, _ = decoder_forward(params, trg, enc_out, dec_mask, enc_dec_mask,
                                   atten_map_save=False)
    logits = jax.block_until_ready(logits)
    assert logits.shape == (B, S_dec, vocab_size)

    ref = ref_decoder(params, trg, enc_out, dec_mask, enc_dec_mask)
    assert jnp.allclose(logits, ref, atol=2e-2, rtol=2e-2), "mismatch vs JAX reference"

    # atten_map_save=True path (exercises the weights-producing attention kernel).
    logits2, a_dec, a_ed = decoder_forward(params, trg, enc_out, dec_mask,
                                           enc_dec_mask, atten_map_save=True)
    logits2 = jax.block_until_ready(logits2)
    assert a_dec.shape == (n_layers, n_heads, S_dec, S_dec)
    assert a_ed.shape == (n_layers, n_heads, S_dec, S_enc)
    assert jnp.allclose(logits2, ref, atol=2e-2, rtol=2e-2), "mismatch (save path)"

    print("KERNEL_OK")
</pallas_src>

<mosaic_0001>
module attributes {stable_mosaic.version = 11 : i64} {
  func.func @_matmul_bias_kernel(%arg0: i32, %arg1: i32, %arg2: i32, %arg3: memref<32x256xbf16, #tpu.memory_space<vmem>>, %arg4: memref<256x384xbf16, #tpu.memory_space<vmem>>, %arg5: memref<1x384xf32, #tpu.memory_space<vmem>>, %arg6: memref<32x384xbf16, #tpu.memory_space<vmem>>, %arg7: memref<32x384xf32, #tpu.memory_space<vmem>>) attributes {dimension_semantics = [#tpu.dimension_semantics<parallel>, #tpu.dimension_semantics<parallel>, #tpu.dimension_semantics<arbitrary>], iteration_bounds = array<i64: 1, 2, 1>, scalar_prefetch = 0 : i64, scratch_operands = 1 : i64, tpu.core_type = #tpu.core_type<tc>, window_params = [{transform_indices = @transform_0, window_bounds = array<i64: 32, 256>}, {transform_indices = @transform_1, window_bounds = array<i64: 256, 384>}, {transform_indices = @transform_2, window_bounds = array<i64: 1, 384>}, {transform_indices = @transform_3, window_bounds = array<i64: 32, 384>}]} {
    %c0_i32 = arith.constant 0 : i32
    %0 = arith.cmpi eq, %arg2, %c0_i32 : i32
    %1 = arith.extui %0 : i1 to i32
    %c0_i32_0 = arith.constant 0 : i32
    %2 = arith.cmpi ne, %1, %c0_i32_0 : i32
    scf.if %2 {
      %cst_10 = arith.constant 0.000000e+00 : f32
      %12 = vector.broadcast %cst_10 : f32 to vector<32x384xf32>
      %c0_11 = arith.constant 0 : index
      %c0_12 = arith.constant 0 : index
      %13 = vector.load %arg7[%c0_11, %c0_12] : memref<32x384xf32, #tpu.memory_space<vmem>>, vector<32x384xf32>
      tpu.vector_store %arg7[%c0_11, %c0_12], %12 {strides = array<i32>} : memref<32x384xf32, #tpu.memory_space<vmem>>, vector<32x384xf32>,
    } else {
    }
    %c0 = arith.constant 0 : index
    %c0_1 = arith.constant 0 : index
    %3 = vector.load %arg7[%c0, %c0_1] : memref<32x384xf32, #tpu.memory_space<vmem>>, vector<32x384xf32>
    %c0_2 = arith.constant 0 : index
    %c0_3 = arith.constant 0 : index
    %4 = vector.load %arg3[%c0_2, %c0_3] : memref<32x256xbf16, #tpu.memory_space<vmem>>, vector<32x256xbf16>
    %c0_4 = arith.constant 0 : index
    %c0_5 = arith.constant 0 : index
    %5 = vector.load %arg4[%c0_4, %c0_5] : memref<256x384xbf16, #tpu.memory_space<vmem>>, vector<256x384xbf16>
    %cst = arith.constant dense<0.000000e+00> : vector<32x384xf32>
    %6 = tpu.matmul %4, %5, %cst {dimension_numbers = #tpu.dot_dimension_numbers<[1], [0], [0], [1], [0, 0, 1, 1], [], []>} : vector<32x256xbf16>, vector<256x384xbf16>, vector<32x384xf32> -> vector<32x384xf32>
    %7 = arith.addf %3, %6 : vector<32x384xf32>
    %c0_6 = arith.constant 0 : index
    %c0_7 = arith.constant 0 : index
    %8 = vector.load %arg7[%c0_6, %c0_7] : memref<32x384xf32, #tpu.memory_space<vmem>>, vector<32x384xf32>
    tpu.vector_store %arg7[%c0_6, %c0_7], %7 {strides = array<i32>} : memref<32x384xf32, #tpu.memory_space<vmem>>, vector<32x384xf32>,
    %c0_i32_8 = arith.constant 0 : i32
    %9 = arith.cmpi eq, %arg2, %c0_i32_8 : i32
    %10 = arith.extui %9 : i1 to i32
    %c0_i32_9 = arith.constant 0 : i32
    %11 = arith.cmpi ne, %10, %c0_i32_9 : i32
    scf.if %11 {
      %c0_10 = arith.constant 0 : index
      %c0_11 = arith.constant 0 : index
      %12 = vector.load %arg7[%c0_10, %c0_11] : memref<32x384xf32, #tpu.memory_space<vmem>>, vector<32x384xf32>
      %c0_12 = arith.constant 0 : index
      %c0_13 = arith.constant 0 : index
      %13 = vector.load %arg5[%c0_12, %c0_13] : memref<1x384xf32, #tpu.memory_space<vmem>>, vector<1x384xf32>
      %14 = vector.broadcast %13 : vector<1x384xf32> to vector<32x384xf32>
      %15 = arith.addf %12, %14 : vector<32x384xf32>
      %16 = arith.truncf %15 : vector<32x384xf32> to vector<32x384xbf16>
      %c0_14 = arith.constant 0 : index
      %c0_15 = arith.constant 0 : index
      %17 = vector.load %arg6[%c0_14, %c0_15] : memref<32x384xbf16, #tpu.memory_space<vmem>>, vector<32x384xbf16>
      tpu.vector_store %arg6[%c0_14, %c0_15], %16 {strides = array<i32>} : memref<32x384xbf16, #tpu.memory_space<vmem>>, vector<32x384xbf16>,
    } else {
    }
    return
  }
  func.func @transform_0(%arg0: i32, %arg1: i32, %arg2: i32) -> (i32, i32) {
    %c0_i32 = arith.constant 0 : i32
    return %arg0, %arg2 : i32, i32
  }
  func.func @transform_1(%arg0: i32, %arg1: i32, %arg2: i32) -> (i32, i32) {
    %c0_i32 = arith.constant 0 : i32
    return %arg2, %arg1 : i32, i32
  }
  func.func @transform_2(%arg0: i32, %arg1: i32, %arg2: i32) -> (i32, i32) {
    %c0_i32 = arith.constant 0 : i32
    %c0_i32_0 = arith.constant 0 : i32
    return %c0_i32, %arg1 : i32, i32
  }
  func.func @transform_3(%arg0: i32, %arg1: i32, %arg2: i32) -> (i32, i32) {
    %c0_i32 = arith.constant 0 : i32
    return %arg0, %arg1 : i32, i32
  }
}

</mosaic_0001>

<bundles_post_ra>
// kernel: tpu_custom_call.1
= control target key start
LH: loop header
LB: loop body
LE: loop exit
PB: predicated region body
PF: predicated region fallthrough
CT: control target
= control target key end

     0   :  { %8 = vsyncpa [#allocation4], 0  ;;  %s1726_s0 = inlined_call_operand.hbm [shape: bf16[32,256], index: 0, kind: input, shape index: {}]   ;;  %s1727_s1 = inlined_call_operand.hbm [shape: bf16[256,768], index: 1, kind: input, shape index: {}]   ;;  %s1728_s2 = inlined_call_operand.vmem [shape: f32[1,768], index: 2, kind: input, shape index: {}]   ;;  %s1729_s3 = inlined_call_operand.hbm [shape: bf16[32,768], index: 3, kind: output, shape index: {}]  }
   0x1   :  { %9 = vsyncpa [#allocation7], 0 }
   0x2   :  { %11 = vsyncpa [#allocation7 + $0x1], 0 }
   0x3   :  { %12 = vsyncpa [#allocation5], 0 }
   0x4   :  { %14 = vsyncpa [#allocation5 + $0x1], 0  ;;  %s1432_s12 = smov 0   ;;  %s1434_s13 = smov 0  }
   0x5   :  { %s1436_s14 = smov 0   ;;  %s1438_s15 = smov 0  }
   0x6   :  { %s1440_s16 = smov 0   ;;  %s1442_s17 = smov 0  }
   0x7 LB: > { %s992_s18 = sadd.s32 4294967295, %s1399_s17   ;;  %s993_s19 = sadd.s32 4294967294, %s1399_s17   ;;  %s1399_s17 = sphi %s1442_s17, %s20_s17   ;;  %s1395_s16 = sphi %s1440_s16, %s1758_s16   ;;  %s1391_s15 = sphi %s1438_s15, %s1757_s15   ;;  %s1387_s14 = sphi %s1436_s14, %s1756_s14   ;;  %s1383_s13 = sphi %s1434_s13, %s1755_s13   ;;  %s1379_s12 = sphi %s1432_s12, %s1754_s12  }
   0x8   : > { %p83_p0 = scmp.ne.s32.totalorder %s1387_s14, %s1383_s13  ;;  %p84_p1 = scmp.eq.s32.totalorder %s1399_s17, 0 }
   0x9   : > { %p89_p2 = scmp.ne.s32.totalorder %s1383_s13, %s1379_s12  ;;  %p1470_p3 = scmp.eq.s32.totalorder %s992_s18, 0 }
   0xa   : > { %p141_p4 = scmp.eq.s32.totalorder %s992_s18, 1  ;;  %p1474_p5 = por %p84_p1, %p83_p0 }
   0xb   : > { %s1736_s21 = scalar_select %p1470_p3, 1, 0 }
   0xc   : > { %p147_p6 = scmp.eq.s32.totalorder %s993_s19, 1  ;;  %p1480_p7 = por %p1470_p3, %p89_p2 }
   0xd   : > { %p1484_p8 = por %p141_p4, %p83_p0  ;;  %p994_p10 = scmp.ge.s32.totalorder %s1399_s17, 1 }
   0xe   : > { %s1738_s23 = scalar_select %p1480_p7, 1, 0 }
   0xf   : > { %s1739_s24 = scalar_select %p1484_p8, 1, 0 }
  0x10   : > { %p1488_p9 = por %p147_p6, %p89_p2  ;;  %p154_p11 = scmp.lt.s32.totalorder %s1399_s17, 3 }
  0x11   : > { %s1401_s27 = smov [#allocation3]   ;;  %p1125_p1 = scmp.lt.s32.totalorder %s1399_s17, 2 }
  0x12   : > { %s1740_s25 = scalar_select %p1488_p9, 1, 0 }
  0x13   : > { %p1494_p12 = pnand %p994_p10, %p154_p11  ;;  %s172_s28 = sshll.u32 %s1401_s27, 4  ;;  %s1498_s28 = int_to_ptr.vmem [resolvable:$true] %s172_s28 }
  0x14   : > { %p1512_p4 = pnand %p1125_p1, %p1474_p5  ;;  %s35_s4 = sadd.s32 1, %s1395_s16 }
  0x15   : > { %s1741_s26 = scalar_select %p1494_p12, 1, 0 }
  0x16   : > { %p1112_p13 = pneg %p1494_p12  ;;  %p1517_p6 = scmp.ge.s32.totalorder %s35_s4, 2 }
  0x17   : > { %s1743_s30 = scalar_select %p1512_p4, 1, 0 }
  0x18   : > { %p1506_p2 = pnand %p1112_p13, %p1470_p3  ;;  %s1255_s8 = scalar_lea.hbm %s1726_s0, 512 }
  0x19   : > { %s1744_s5 = scalar_select %p1517_p6, 1, 0 }
  0x1a   : > { %p1256_p10 = scmp.ne.s32.totalorder %s1726_s0, %s1255_s8  ;;  %p1257_p11 = pneg %p1506_p2 }
  0x1b   : > { %p1262_p1 = scmp.lt.u32.totalorder %s1255_s8, %s1726_s0 }
  0x1c   : > { %p1258_p13 = pnand %p1257_p11, %p1256_p10 }
  0x1e   : > { %p1259_p5 = pneg %p1258_p13 }
  0x20   : > { %p1264_p0 = pnand %p1262_p1, %p1259_p5 }
  0x22   : > { %1267 = shalt.err (!%p1264_p0)
}
  0x23   : > { %s1268_s19 = scalar_lea.vmem %s1498_s28, 512  ;;  %p1276_p3 = scmp.lt.s32.totalorder %s1498_s28, %s1498_s28 }
  0x24   : > { %p1269_p9 = scmp.ne.s32.totalorder %s1498_s28, %s1268_s19  ;;  %p1277_p12 = scmp.lt.s32.totalorder %s1268_s19, %s1268_s19 }
  0x26   : > { %p1271_p8 = pnand %p1269_p9, %p1257_p11  ;;  %p1278_p4 = por %p1277_p12, %p1276_p3 }
  0x28   : > { %p1272_p7 = pneg %p1271_p8 }
  0x2a   : > { %p1279_p6 = pnand %p1278_p4, %p1272_p7 }
  0x2c   : > { %1282 = shalt.err (!%p1279_p6)
}
  0x2d   : > { %s1402_s22 = smov 128   ;;  %s1403_s27 = smov 8  }
  0x2e   : > { %1115 = dma.hbm_to_vmem [thread:$0]  (!%p1506_p2), %s1726_s0, 512, %s1498_s28, [#allocation4], %s1402_s22, %s1402_s22, %s1403_s27  }
  0x2f   : > { %s186_s8 = sand.u32 1, %s1387_s14   ;;  %p1745_p3 = scmp.ne.s32.totalorder %s1744_s5, 0 }
  0x30   : > { %s1101_s9 = smul.u32 384, %s186_s8  ;;  %s1746_s22 = sadd.s32 1, %s1387_s14 }
  0x31   : > { %s1760_s4 = smov (%p1745_p3, %s35_s4), 0  ;;  %s1063_s11 = smul.u32 192, %s1395_s16 }
  0x32   : > { %s72_s10 = ssub.s32 %s1395_s16, %s1760_s4  ;;  %s190_s28 = scalar_lea.vmem [#allocation6], %s1101_s9 }
  0x33   : > { %p74_p7 = scmp.eq.s32.totalorder %s72_s10, 0  ;;  %s1553_s20 = scalar_lea.hbm %s1727_s1, %s1063_s11 }
  0x34   : > { %s200_s29 = sshll.u32 %s190_s28, 4  ;;  %s1562_s27 = scalar_lea.sflag [#allocation7], %s186_s8  ;;  %s1560_s29 = int_to_ptr.vmem [resolvable:$true] %s200_s29 }
  0x35   : > { %s1558_s5 = scalar_select %p74_p7, %s1387_s14, %s1746_s22  }
  0x36   : > { %s1283_s6 = scalar_lea.hbm %s1553_s20, 6144  ;;  %p1747_p9 = scmp.ne.s32.totalorder %s1743_s30, 0 }
  0x37   : > { %p1284_p8 = scmp.ne.s32.totalorder %s1553_s20, %s1283_s6  ;;  %s1288_s9 = scalar_lea.hbm %s1727_s1, 12288 }
  0x38   : > { %p1285_p12 = pneg %p1747_p9  ;;  %p1289_p4 = scmp.lt.u32.totalorder %s1553_s20, %s1727_s1 }
  0x39   : > { %p1290_p6 = scmp.lt.u32.totalorder %s1288_s9, %s1283_s6  ;;  %p1292_p11 = scmp.lt.u32.totalorder %s1283_s6, %s1553_s20 }
  0x3a   : > { %p1286_p0 = pnand %p1285_p12, %p1284_p8 }
  0x3b   : > { %p1291_p10 = por %p1290_p6, %p1289_p4 }
  0x3c   : > { %p1287_p2 = pneg %p1286_p0 }
  0x3d   : > { %p1293_p13 = por %p1292_p11, %p1291_p10 }
  0x3f   : > { %p1294_p5 = pnand %p1293_p13, %p1287_p2 }
  0x41   : > { %1297 = shalt.err (!%p1294_p5)
}
  0x42   : > { %s1298_s8 = scalar_lea.vmem %s1560_s29, 6144  ;;  %s1404_s19 = smov [#allocation6]  }
  0x43   : > { %p1299_p1 = scmp.ne.s32.totalorder %s1560_s29, %s1298_s8  ;;  %s1303_s28 = sshll.u32 %s1404_s19, 4  ;;  %s1304_s28 = int_to_ptr.vmem [resolvable:$false] %s1303_s28 }
  0x44   : > { %s1305_s22 = scalar_lea.vmem %s1304_s28, 12288  ;;  %p1306_p8 = scmp.lt.s32.totalorder %s1560_s29, %s1304_s28 }
  0x45   : > { %p1301_p3 = pnand %p1299_p1, %p1285_p12  ;;  %p1307_p0 = scmp.lt.s32.totalorder %s1305_s22, %s1298_s8 }
  0x47   : > { %p1302_p7 = pneg %p1301_p3  ;;  %p1308_p4 = por %p1307_p0, %p1306_p8 }
  0x49   : > { %p1309_p6 = pnand %p1308_p4, %p1302_p7 }
  0x4b   : > { %1312 = shalt.err (!%p1309_p6)
}
  0x4c   : > { %s1405_s6 = smov 384   ;;  %s1406_s7 = smov 192  }
  0x4d   : > { %s1407_s10 = smov 12   ;;  %p1748_p12 = scmp.ne.s32.totalorder %s1741_s26, 0 }
  0x4e   : > { %1119 = dma.hbm_to_vmem [thread:$0]  (!%p1747_p9), %s1553_s20, 6144, %s1560_s29, %s1562_s27, %s1405_s6, %s1406_s7, %s1407_s10  }
  0x4f   : > { %220 = sbr.rel (%p1748_p12) target bundleno = 400 (0x190), region = 32  ;;  %p1749_p2 = scmp.ne.s32.totalorder (!%p1748_p12), %s1736_s21, 0 }
  0x56   : > { %1366 = dma.done.wait (%p1749_p2), [#allocation4], 512  }
  0x57   : > { %1368 = vsyncadd (%p1749_p2), [#allocation4], 4294966784  ;;  %s1597_s9 = sand.u32 1, %s1383_s13   ;;  %p1750_p9 = scmp.ne.s32.totalorder %s1738_s23, 0 }
  0x58   : > { %s1102_s11 = smul.u32 384, %s1597_s9  ;;  %s227_s18 = scalar_lea.sflag [#allocation7], %s1597_s9 }
  0x5a   : > { %s1601_s8 = scalar_lea.vmem [#allocation6], %s1102_s11 }
  0x5b   : > { %1370 = dma.done.wait (%p1750_p9), %s227_s18, 6144  }
  0x5c   : > { %1372 = vsyncadd (%p1750_p9), %s227_s18, 4294961152  ;;  %v1185_v0 = vld [vmem:[%s1601_s8 + $0x4] ss:$12 sps:$4 sm:$0xff]   ;;  %v1187_v1 = vld [vmem:[%s1601_s8] ss:$12 sps:$4 sm:$0xff]   ;;  %s261_s20 = smul.u32 3, %s1391_s15  ;;  %v784_v52 = vlaneseq }
  0x5d   : > { %641 = vmatprep.subr.bf16.mxu0 %v1185_v0  ;;  %v1188_v2 = vld [vmem:[%s1601_s8 + $0x1c] ss:$12 sps:$4 sm:$0xff]   ;;  %v1190_v3 = vld [vmem:[%s1601_s8 + $0x18] ss:$12 sps:$4 sm:$0xff]   ;;  %v1191_v4 = vld [vmem:[%s1601_s8 + $0x34] ss:$12 sps:$4 sm:$0xff]  }
  0x5e   : > { %642 = vmatpush1.bf16.msra.mxu0 %v1187_v1  ;;  %v1193_v5 = vld [vmem:[%s1601_s8 + $0x30] ss:$12 sps:$4 sm:$0xff]   ;;  %v1194_v6 = vld [vmem:[%s1601_s8 + $0x4c] ss:$12 sps:$4 sm:$0xff]   ;;  %v1206_v7 = vld [vmem:[%s1601_s8 + $0xc8] ss:$12 sps:$4 sm:$0xff]  }
  0x5f   : > { %643 = vmatprep.subr.bf16.mxu0 %v1188_v2  ;;  %v1196_v8 = vld [vmem:[%s1601_s8 + $0x48] ss:$12 sps:$4 sm:$0xff]   ;;  %v1197_v9 = vld [vmem:[%s1601_s8 + $0x64] ss:$12 sps:$4 sm:$0xff]   ;;  %1073 = vmatprep.subr.bf16.mxu1 %v1206_v7  ;;  %v1211_v11 = vld [vmem:[%s1601_s8 + $0xe0] ss:$12 sps:$4 sm:$0xff]  }
  0x60   : > { %v1209_v10 = vld [vmem:[%s1601_s8 + $0x8] ss:$12 sps:$4 sm:$0xff]   ;;  %v1199_v12 = vld [vmem:[%s1601_s8 + $0x60] ss:$12 sps:$4 sm:$0xff]   ;;  %v1216_v15 = vld [vmem:[%s1601_s8 + $0xf8] ss:$12 sps:$4 sm:$0xff]  }
  0x61   : > { %1074 = vmatpush3.bf16.msra.mxu1 %v1209_v10  ;;  %v1200_v13 = vld [vmem:[%s1601_s8 + $0x7c] ss:$12 sps:$4 sm:$0xff]   ;;  %v1214_v14 = vld [vmem:[%s1601_s8 + $0x20] ss:$12 sps:$4 sm:$0xff]   ;;  %v1202_v16 = vld [vmem:[%s1601_s8 + $0x78] ss:$12 sps:$4 sm:$0xff]  }
  0x62   : > { %644 = vmatpush1.bf16.msra.mxu0 %v1190_v3  ;;  %1075 = vmatprep.subr.bf16.mxu1 %v1211_v11  ;;  %v1219_v17 = vld [vmem:[%s1601_s8 + $0x38] ss:$12 sps:$4 sm:$0xff]   ;;  %v1203_v18 = vld [vmem:[%s1601_s8 + $0x94] ss:$12 sps:$4 sm:$0xff]   ;;  %v1221_v19 = vld [vmem:[%s1601_s8 + $0x110] ss:$12 sps:$4 sm:$0xff]  }
  0x63   : > { %645 = vmatprep.subr.bf16.mxu0 %v1191_v4  ;;  %v1205_v20 = vld [vmem:[%s1601_s8 + $0x90] ss:$12 sps:$4 sm:$0xff]   ;;  %v1226_v22 = vld [vmem:[%s1601_s8 + $0x128] ss:$12 sps:$4 sm:$0xff]   ;;  %v1207_v23 = vld [vmem:[%s1601_s8 + $0xac] ss:$12 sps:$4 sm:$0xff]  }
  0x64   : > { %v1224_v21 = vld [vmem:[%s1601_s8 + $0x50] ss:$12 sps:$4 sm:$0xff]   ;;  %v1210_v24 = vld [vmem:[%s1601_s8 + $0xa8] ss:$12 sps:$4 sm:$0xff]   ;;  %v1231_v26 = vld [vmem:[%s1601_s8 + $0x140] ss:$12 sps:$4 sm:$0xff]  }
  0x65   : > { %1076 = vmatpush3.bf16.msra.mxu1 %v1214_v14  ;;  %v1229_v25 = vld [vmem:[%s1601_s8 + $0x68] ss:$12 sps:$4 sm:$0xff]   ;;  %v1212_v27 = vld [vmem:[%s1601_s8 + $0xc4] ss:$12 sps:$4 sm:$0xff]   ;;  %v1215_v28 = vld [vmem:[%s1601_s8 + $0xc0] ss:$12 sps:$4 sm:$0xff]  }
  0x66   : > { %646 = vmatpush1.bf16.msra.mxu0 %v1193_v5  ;;  %1077 = vmatprep.subr.bf16.mxu1 %v1216_v15  ;;  %v1234_v29 = vld [vmem:[%s1601_s8 + $0x80] ss:$12 sps:$4 sm:$0xff]   ;;  %v1236_v30 = vld [vmem:[%s1601_s8 + $0x158] ss:$12 sps:$4 sm:$0xff]   ;;  %v1217_v31 = vld [vmem:[%s1601_s8 + $0xdc] ss:$12 sps:$4 sm:$0xff]  }
  0x67   : > { %647 = vmatprep.subr.bf16.mxu0 %v1194_v6  ;;  %v1239_v32 = vld [vmem:[%s1601_s8 + $0x98] ss:$12 sps:$4 sm:$0xff]   ;;  %v1241_v34 = vld [vmem:[%s1601_s8 + $0x170] ss:$12 sps:$4 sm:$0xff]   ;;  %v1222_v35 = vld [vmem:[%s1601_s8 + $0xf4] ss:$12 sps:$4 sm:$0xff]  }
  0x68   : > { %v1220_v33 = vld [vmem:[%s1601_s8 + $0xd8] ss:$12 sps:$4 sm:$0xff]   ;;  %v1244_v37 = vld [vmem:[%s1601_s8 + $0xb0] ss:$12 sps:$4 sm:$0xff]   ;;  %v1246_v40 = vld [vmem:[#allocation3] ss:$8 sps:$4 sm:$0xff]  }
  0x69   : > { %1078 = vmatpush3.bf16.msra.mxu1 %v1219_v17  ;;  %v1248_v36 = vld [vmem:[#allocation3 + $0x4] ss:$8 sps:$4 sm:$0xff]   ;;  %v1225_v38 = vld [vmem:[%s1601_s8 + $0xf0] ss:$12 sps:$4 sm:$0xff]   ;;  %v1230_v42 = vld [vmem:[%s1601_s8 + $0x108] ss:$12 sps:$4 sm:$0xff]  }
  0x6a   : > { %648 = vmatpush1.bf16.msra.mxu0 %v1196_v8  ;;  %1079 = vmatprep.subr.bf16.mxu1 %v1221_v19  ;;  %v1227_v39 = vld [vmem:[%s1601_s8 + $0x10c] ss:$12 sps:$4 sm:$0xff]   ;;  %v1252_v41 = vld [vmem:[#allocation3 + $0x14] ss:$8 sps:$4 sm:$0xff]   ;;  %v1232_v43 = vld [vmem:[%s1601_s8 + $0x124] ss:$12 sps:$4 sm:$0xff]  }
  0x6b   : > { %649 = vmatprep.subr.bf16.mxu0 %v1197_v9  ;;  %726 = vmatprep.mubr.bf16.mxu1 %v1248_v36  ;;  %v1235_v44 = vld [vmem:[%s1601_s8 + $0x120] ss:$12 sps:$4 sm:$0xff]   ;;  %v1237_v45 = vld [vmem:[%s1601_s8 + $0x13c] ss:$12 sps:$4 sm:$0xff]   ;;  %v1254_v46 = vld [vmem:[#allocation3 + $0x10] ss:$8 sps:$4 sm:$0xff]  }
  0x6c   : > { %673 = vmatprep.mubr.bf16.mxu0 %v1248_v36  ;;  %v1240_v47 = vld [vmem:[%s1601_s8 + $0x138] ss:$12 sps:$4 sm:$0xff]   ;;  %v1242_v48 = vld [vmem:[%s1601_s8 + $0x154] ss:$12 sps:$4 sm:$0xff]   ;;  %v1245_v49 = vld [vmem:[%s1601_s8 + $0x150] ss:$12 sps:$4 sm:$0xff]  }
  0x6d   : > { %1080 = vmatpush3.bf16.msra.mxu1 %v1224_v21  ;;  %v1249_v50 = vld [vmem:[%s1601_s8 + $0x16c] ss:$12 sps:$4 sm:$0xff]   ;;  %v1251_v51 = vld [vmem:[%s1601_s8 + $0x168] ss:$12 sps:$4 sm:$0xff]   ;;  %p262_p10 = scmp.lt.s32.totalorder %s261_s20, 5  ;;  %v785_v53 = vshrl.u32 %v784_v52, 7 }
  0x6e   : > { %650 = vmatpush1.bf16.msra.mxu0 %v1199_v12  ;;  %1081 = vmatprep.subr.bf16.mxu1 %v1226_v22  ;;  %s1103_s30 = smul.u32 48, %s1597_s9  ;;  %p1751_p13 = scmp.ne.s32.totalorder %s1739_s24, 0 }
  0x6f   : > { %651 = vmatprep.subr.bf16.mxu0 %v1200_v13  ;;  %s1762_s20 = smov (!%p262_p10, %s261_s20), 5  ;;  %v794_v54 = vsub.s32 2, %v785_v53  ;;  %v786_v10 = vsub.s32 0, %v785_v53  ;;  %v790_v13 = vsub.s32 1, %v785_v53  ;;  %s1072_s19 = smul.u32 192, %s1391_s15 }
  0x70   : > { %s264_s26 = scalar_lea.vmem %s1728_s2, %s1762_s20  ;;  %s1660_s29 = scalar_lea.vmem [#allocation8], %s1103_s30 }
  0x71   : > { %1082 = vmatpush3.bf16.msra.mxu1 %v1229_v25  ;;  %v782_v55 = vld [vmem:[%s264_s26] sm:$0x7]  ;;  %s876_s27 = sshll.u32 %s1660_s29, 4  ;;  %s1675_s6 = scalar_lea.hbm %s1729_s3, %s1072_s19  ;;  %s1670_s27 = int_to_ptr.vmem [resolvable:$true] %s876_s27 }
  0x72   : > { %652 = vmatpush1.bf16.msra.mxu0 %v1202_v16  ;;  %1083 = vmatprep.subr.bf16.mxu1 %v1231_v26  ;;  %v795_v57 = vrot.slane %v782_v55, %v794_v54  ;;  %v787_v15 = vrot.slane %v782_v55, %v786_v10  ;;  %v791_v16 = vrot.slane %v782_v55, %v790_v13  ;;  %s860_s15 = scalar_lea.sflag [#allocation5], %s1597_s9  ;;  %s1313_s7 = scalar_lea.vmem %s1670_s27, 768 }
  0x73   : > { %653 = vmatprep.subr.bf16.mxu0 %v1203_v18  ;;  %p1314_p11 = scmp.ne.s32.totalorder %s1670_s27, %s1313_s7  ;;  %s1408_s10 = smov [#allocation8]  }
  0x74   : > { %s1317_s11 = sshll.u32 %s1408_s10, 4  ;;  %s1318_s11 = int_to_ptr.vmem [resolvable:$false] %s1317_s11 }
  0x75   : > { %1084 = vmatpush3.bf16.msra.mxu1 %v1234_v29  ;;  %p1315_p5 = pnand %p1314_p11, %p1751_p13  ;;  %s1319_s18 = scalar_lea.vmem %s1318_s11, 1536 }
  0x76   : > { %654 = vmatpush1.bf16.msra.mxu0 %v1205_v20  ;;  %1085 = vmatprep.subr.bf16.mxu1 %v1236_v30  ;;  %p1320_p3 = scmp.lt.s32.totalorder %s1670_s27, %s1318_s11  ;;  %p1321_p7 = scmp.lt.s32.totalorder %s1319_s18, %s1313_s7 }
  0x77   : > { %655 = vmatprep.subr.bf16.mxu0 %v1207_v23  ;;  %p1316_p1 = pneg %p1315_p5 }
  0x78   : > { %p1322_p8 = por %p1321_p7, %p1320_p3 }
  0x79   : > { %1086 = vmatpush3.bf16.msra.mxu1 %v1239_v32 }
  0x7a   : > { %656 = vmatpush1.bf16.msra.mxu0 %v1210_v24  ;;  %1087 = vmatprep.subr.bf16.mxu1 %v1241_v34  ;;  %p1323_p0 = pnand %p1322_p8, %p1316_p1 }
  0x7b   : > { %657 = vmatprep.subr.bf16.mxu0 %v1212_v27 }
  0x7d   : > { %1088 = vmatpush3.bf16.msra.mxu1 %v1244_v37 }
  0x7e   : > { %658 = vmatpush1.bf16.msra.mxu0 %v1215_v28 }
  0x7f   : > { %659 = vmatprep.subr.bf16.mxu0 %v1217_v31 }
  0x80   : > { %727 = vmatmul.mubr.bf16.vlgmr.msra.gmra.mrb[0].mxu1 %v1246_v40 }
  0x81   : > { %734 = vmatprep.mubr.bf16.mxu1 %v1252_v41 }
  0x82   : > { %660 = vmatpush1.bf16.msra.mxu0 %v1220_v33 }
  0x83   : > { %661 = vmatprep.subr.bf16.mxu0 %v1222_v35 }
  0x86   : > { %662 = vmatpush1.bf16.msra.mxu0 %v1225_v38 }
  0x87   : > { %663 = vmatprep.subr.bf16.mxu0 %v1227_v39 }
  0x88   : > { %735 = vmatmul.mubr.bf16.gmra.mrb[4].mxu1 %v1254_v46 }
  0x8a   : > { %664 = vmatpush1.bf16.msra.mxu0 %v1230_v42 }
  0x8b   : > { %665 = vmatprep.subr.bf16.mxu0 %v1232_v43 }
  0x8e   : > { %666 = vmatpush1.bf16.msra.mxu0 %v1235_v44 }
  0x8f   : > { %667 = vmatprep.subr.bf16.mxu0 %v1237_v45 }
  0x92   : > { %668 = vmatpush1.bf16.msra.mxu0 %v1240_v47 }
  0x93   : > { %669 = vmatprep.subr.bf16.mxu0 %v1242_v48 }
  0x96   : > { %670 = vmatpush1.bf16.msra.mxu0 %v1245_v49 }
  0x97   : > { %671 = vmatprep.subr.bf16.mxu0 %v1249_v50 }
  0x9a   : > { %672 = vmatpush1.bf16.msra.mxu0 %v1251_v51 }
  0x9d   : > { %674 = vmatmul.mubr.bf16.vlgmr.msra.gmra.mrb[0].mxu0 %v1246_v40 }
  0x9e   : > { %683 = vmatprep.mubr.bf16.mxu0 %v1252_v41 }
  0xa5   : > { %684 = vmatmul.mubr.bf16.gmra.mrb[4].mxu0 %v1254_v46 }
 0x153   : > { %v1089_v56 = vpop.f32.mrb[0].mxu1 }
 0x154   : > { %v1090_v58 = vpop.f32.mrb[1].mxu1 }
 0x155   : > { %v1091_v59 = vadd.f32 %v1090_v58, %v1089_v56  ;;  %v1092_v60 = vpop.f32.mrb[2].mxu1 }
 0x156   : > { %v1093_v61 = vpop.f32.mrb[3].mxu1 }
 0x157   : > { %v801_v62 = vadd.f32 %v1091_v59, %v795_v57  ;;  %v1094_v63 = vadd.f32 %v1093_v61, %v1092_v60 }
 0x159   : > { %v1065_v0 = vpack.c.bf16 %v801_v62, %v801_v62  ;;  %v804_v1 = vadd.f32 %v1094_v63, %v795_v57 }
 0x15b   : > { %852 = vst [vmem:[%s1660_s29 + $0x8] sm:$0xf] %v1065_v0  ;;  %v1067_v2 = vpack.c.bf16 %v804_v1, %v804_v1  ;;  %v1095_v3 = vpop.f32.mrb[4].mxu1 }
 0x15c   : > { %v1096_v4 = vpop.f32.mrb[5].mxu1 }
 0x15d   : > { %854 = vst [vmem:[%s1660_s29 + $0x14] sm:$0xf] %v1067_v2  ;;  %v1097_v5 = vadd.f32 %v1096_v4, %v1095_v3  ;;  %v1098_v6 = vpop.f32.mrb[6].mxu1 }
 0x15e   : > { %v1099_v7 = vpop.f32.mrb[7].mxu1 }
 0x15f   : > { %v807_v8 = vadd.f32 %v1097_v5, %v795_v57  ;;  %v1100_v9 = vadd.f32 %v1099_v7, %v1098_v6 }
 0x161   : > { %v1069_v11 = vpack.c.bf16 %v807_v8, %v807_v8  ;;  %v810_v12 = vadd.f32 %v1100_v9, %v795_v57 }
 0x163   : > { %856 = vst [vmem:[%s1660_s29 + $0x20] sm:$0xf] %v1069_v11  ;;  %v1071_v14 = vpack.c.bf16 %v810_v12, %v810_v12 }
 0x165   : > { %858 = vst [vmem:[%s1660_s29 + $0x2c] sm:$0xf] %v1071_v14 }
 0x170   : > { %v675_v17 = vpop.f32.mrb[0].mxu0 }
 0x171   : > { %v799_v18 = vadd.f32 %v787_v15, %v675_v17  ;;  %v677_v19 = vpop.f32.mrb[1].mxu0 }
 0x172   : > { %v800_v20 = vadd.f32 %v791_v16, %v677_v19  ;;  %v679_v21 = vpop.f32.mrb[2].mxu0 }
 0x173   : > { %v802_v22 = vadd.f32 %v787_v15, %v679_v21  ;;  %v681_v23 = vpop.f32.mrb[3].mxu0 }
 0x174   : > { %v1064_v24 = vpack.c.bf16 %v800_v20, %v799_v18  ;;  %v803_v25 = vadd.f32 %v791_v16, %v681_v23 }
 0x176   : > { %851 = vst [vmem:[%s1660_s29] sm:$0xff] %v1064_v24  ;;  %v1066_v26 = vpack.c.bf16 %v803_v25, %v802_v22 }
 0x178   : > { %853 = vst [vmem:[%s1660_s29 + $0xc] sm:$0xff] %v1066_v26  ;;  %v685_v27 = vpop.f32.mrb[4].mxu0 }
 0x179   : > { %v805_v28 = vadd.f32 %v787_v15, %v685_v27  ;;  %v687_v29 = vpop.f32.mrb[5].mxu0 }
 0x17a   : > { %v806_v30 = vadd.f32 %v791_v16, %v687_v29  ;;  %v689_v31 = vpop.f32.mrb[6].mxu0 }
 0x17b   : > { %v808_v32 = vadd.f32 %v787_v15, %v689_v31  ;;  %v691_v33 = vpop.f32.mrb[7].mxu0 }
 0x17c   : > { %v1068_v34 = vpack.c.bf16 %v806_v30, %v805_v28  ;;  %v809_v35 = vadd.f32 %v791_v16, %v691_v33 }
 0x17e   : > { %855 = vst [vmem:[%s1660_s29 + $0x18] sm:$0xff] %v1068_v34  ;;  %v1070_v36 = vpack.c.bf16 %v809_v35, %v808_v32 }
 0x180   : > { %857 = vst [vmem:[%s1660_s29 + $0x24] sm:$0xff] %v1070_v36 }
 0x181   : > { %1326 = shalt.err (!%p1323_p0)
}
 0x182   : > { %s1327_s8 = scalar_lea.hbm %s1675_s6, 768  ;;  %s1331_s23 = scalar_lea.hbm %s1729_s3, 1536 }
 0x183   : > { %p1328_p4 = scmp.ne.s32.totalorder %s1675_s6, %s1327_s8  ;;  %p1332_p2 = scmp.lt.u32.totalorder %s1675_s6, %s1729_s3 }
 0x184   : > { %p1333_p9 = scmp.lt.u32.totalorder %s1331_s23, %s1327_s8  ;;  %p1335_p11 = scmp.lt.u32.totalorder %s1327_s8, %s1675_s6 }
 0x185   : > { %p1329_p6 = pnand %p1328_p4, %p1751_p13 }
 0x186   : > { %p1334_p10 = por %p1333_p9, %p1332_p2 }
 0x187   : > { %p1330_p12 = pneg %p1329_p6 }
 0x188   : > { %p1336_p5 = por %p1335_p11, %p1334_p10 }
 0x18a   : > { %p1337_p1 = pnand %p1336_p5, %p1330_p12 }
 0x18c   : > { %1340 = shalt.err (!%p1337_p1)
}
 0x18d   : > { %s1409_s29 = smov 192   ;;  %s1410_s19 = smov 384  }
 0x18e   : > { %s1411_s28 = smov 12  }
 0x18f   : > { %1110 = dma.vmem_to_hbm [thread:$0]  (%p1751_p13), %s1670_s27, 768, %s1675_s6, %s860_s15, %s1409_s29, %s1410_s19, %s1411_s28  }
 0x190 PF: > { %s891_s22 = sand.u32 1, %s1379_s12   ;;  %p1752_p3 = scmp.ne.s32.totalorder %s1740_s25, 0 }
 0x191   : > { %p1753_p7 = scmp.ge.s32.totalorder %s1399_s17, 2  ;;  %s892_s7 = scalar_lea.sflag [#allocation5], %s891_s22 }
 0x193   : > { %p1121_p8 = pnand %p1753_p7, %p1752_p3 }
 0x195   : > { %1374 = dma.done.wait (!%p1121_p8), %s892_s7, 768  }
 0x196   : > { %1376 = vsyncadd (!%p1121_p8), %s892_s7, 4294966528  ;;  %s20_s17 = sadd.s32 1, %s1399_s17   ;;  %s1754_s12 = smov %s1383_s13 }
 0x197   : > { %p17_p0 = scmp.ge.s32.totalorder %s20_s17, 4   ;;  %s1755_s13 = smov %s1387_s14 }
 0x198   : > { %s1756_s14 = smov %s1558_s5  ;;  %s1757_s15 = smov %s1395_s16 }
 0x199   : > { %s1758_s16 = smov %s1760_s4  ;;  %19 = sbr.rel (!%p17_p0) target bundleno = 7 (0x7), region = 94 }
 0x1a0   :  { %897 = vsyncpa [#allocation4], 1 }
 0x1a1   :  { %899 = vsyncpa [#allocation4 + $0x1], 1 }
 0x1a2   :  { %900 = vsyncpa [#allocation7], 1 }
 0x1a3   :  { %902 = vsyncpa [#allocation7 + $0x1], 1 }
 0x1a4   :  { %903 = vsyncpa [#allocation5], 1 }
 0x1a5   :  { %905 = vsyncpa [#allocation5 + $0x1], 1 }

</bundles_post_ra>
